<compile_context>
chip_gen: v7x
topology: tpu7x:2x2x1
jax: 0.10.0
libtpu: 0.0.40
codegen_flags: <defaults>
</compile_context>

<pallas_src>
import functools

import jax
import jax.numpy as jnp
from jax.experimental import pallas as pl
from jax.experimental.pallas import tpu as pltpu


_P_OUT = 128        # lane-dense padded output width (cols 0..E-1 = u, cols E..2E-1 = std)
_MAX_TILE_B = 512   # batch tile cap (review: 512-1024 reaches ~85% of HBM roofline vs 63% at 256)


# ----------------------------------------------------------------------------- kernel
def _fused_critic_kernel(
    s_ref, a_ref,
    w1s_ref, w1a_ref, b1_ref,
    w2_ref, b2_ref,
    w3_ref, b3_ref,
    mask_ref,
    out_ref,
    *, matmul_dtype,
):
    s = s_ref[...].astype(matmul_dtype)
    a = a_ref[...].astype(matmul_dtype)

    # Layer 1 (concat expressed as a split matmul: x @ W1 == s @ W1s + a @ W1a).
    h = (jnp.dot(s, w1s_ref[...], preferred_element_type=jnp.float32)
         + jnp.dot(a, w1a_ref[...], preferred_element_type=jnp.float32)
         + b1_ref[...])
    h = jnp.maximum(h, 0.0)

    # Layer 2 (block-diagonal over the 2E heads => every head stays independent).
    h = jnp.dot(h.astype(matmul_dtype), w2_ref[...],
                preferred_element_type=jnp.float32) + b2_ref[...]
    h = jnp.maximum(h, 0.0)

    # Layer 3 -> (tile_b, 128): col e = u_e, col E+e = z_e (pre-softplus), rest zeros.
    y = jnp.dot(h.astype(matmul_dtype), w3_ref[...],
                preferred_element_type=jnp.float32) + b3_ref[...]

    # Softplus (torch default: beta=1, threshold=20) + 1e-6 on std columns only.
    # mask_ref is a (1, 128) f32 vector: 1.0 on std columns, 0.0 elsewhere.
    sp = jnp.where(y > 20.0, y, jnp.log1p(jnp.exp(jnp.minimum(y, 20.0)))) + 1e-6
    m = mask_ref[...]
    out_ref[...] = y + m * (sp - y)


# ----------------------------------------------------------------------------- wrapper
@functools.partial(jax.jit, static_argnames=("num_critics", "matmul_dtype"))
def ctd4_ensemble_forward(state, action, packed, *, num_critics,
                          matmul_dtype=jnp.float32):
    """Run E fused critics in one pallas_call (ensemble folded into the lane axis).

    state:  (B, obs_dim) f32
    action: (B, act_dim) f32
    packed: dict of ensemble-fused parameters (see pack_ensemble).
    Returns (u, std), each of shape (E, B, 1), f32.
    """
    B, obs_dim = state.shape
    act_dim = action.shape[1]
    n1 = packed["w1s"].shape[1]          # E * 2H (fused hidden width)
    E = num_critics

    tile_b = B if B <= _MAX_TILE_B else _MAX_TILE_B
    n_bt = pl.cdiv(B, tile_b)

    s_in = state.astype(matmul_dtype)
    a_in = action.astype(matmul_dtype)
    w1s = packed["w1s"].astype(matmul_dtype)
    w1a = packed["w1a"].astype(matmul_dtype)
    w2 = packed["w2"].astype(matmul_dtype)
    w3 = packed["w3"].astype(matmul_dtype)
    b1, b2, b3, mask = packed["b1"], packed["b2"], packed["b3"], packed["mask"]

    const = lambda i: (0, 0)   # weights/biases: constant block index => VMEM-resident
    kernel = functools.partial(_fused_critic_kernel, matmul_dtype=matmul_dtype)

    out = pl.pallas_call(
        kernel,
        out_shape=jax.ShapeDtypeStruct((B, _P_OUT), jnp.float32),
        grid=(n_bt,),
        in_specs=[
            pl.BlockSpec((tile_b, obs_dim), lambda i: (i, 0)),
            pl.BlockSpec((tile_b, act_dim), lambda i: (i, 0)),
            pl.BlockSpec((obs_dim, n1), const),
            pl.BlockSpec((act_dim, n1), const),
            pl.BlockSpec((1, n1), const),
            pl.BlockSpec((n1, n1), const),
            pl.BlockSpec((1, n1), const),
            pl.BlockSpec((n1, _P_OUT), const),
            pl.BlockSpec((1, _P_OUT), const),
            pl.BlockSpec((1, _P_OUT), const),
        ],
        out_specs=pl.BlockSpec((tile_b, _P_OUT), lambda i: (i, 0)),
        compiler_params=pltpu.CompilerParams(
            # Batch axis is the only grid axis => it is what v7x splits across its 2 TCs.
            dimension_semantics=("parallel",),
            # Explicit scoped-VMEM limit (safe on v5e/v6e/v7x; working set is ~1-3 MiB).
            vmem_limit_bytes=32 << 20,
        ),
    )(s_in, a_in, w1s, w1a, b1, w2, b2, w3, b3, mask)

    # Lazy slices of the single shared slab (no per-critic slabs materialized).
    u = jnp.transpose(out[:, :E])[:, :, None]           # (E, B, 1)
    std = jnp.transpose(out[:, E:2 * E])[:, :, None]    # (E, B, 1)
    return u, std


def base_critic_forward(state, action, params, *, matmul_dtype=jnp.float32):
    """Single-critic API matching BaseCritic.forward -> (u, std), each (B, 1)."""
    packed = pack_ensemble([params], state.shape[1])
    u, std = ctd4_ensemble_forward(state, action, packed, num_critics=1,
                                   matmul_dtype=matmul_dtype)
    return u[0], std[0]


# ----------------------------------------------------------------------------- packing
def pack_ensemble(per_critic_params, obs_dim, p_out=_P_OUT):
    """Fuse mean/std heads of ALL critics into a single wide 3-layer chain.

    Head order along the fused hidden axis: [mean_0 .. mean_{E-1}, std_0 .. std_{E-1}],
    each head occupying a contiguous block of H hidden units.
    """
    E = len(per_critic_params)
    H = per_critic_params[0]["mw1"].shape[1]
    n1 = 2 * E * H
    assert 2 * E <= p_out, "too many critics for one 128-lane output slab"

    w1_blocks = ([p["mw1"] for p in per_critic_params]
                 + [p["sw1"] for p in per_critic_params])
    b1_blocks = ([p["mb1"] for p in per_critic_params]
                 + [p["sb1"] for p in per_critic_params])
    w2_blocks = ([p["mw2"] for p in per_critic_params]
                 + [p["sw2"] for p in per_critic_params])
    b2_blocks = ([p["mb2"] for p in per_critic_params]
                 + [p["sb2"] for p in per_critic_params])
    w3_cols = ([p["mw3"][:, 0] for p in per_critic_params]
               + [p["sw3"][:, 0] for p in per_critic_params])
    b3_vals = ([p["mb3"][0, 0] for p in per_critic_params]
               + [p["sb3"][0, 0] for p in per_critic_params])

    w1 = jnp.concatenate(w1_blocks, axis=1)                       # (d_in, 2EH)
    b1 = jnp.concatenate(b1_blocks, axis=1)                       # (1, 2EH)
    # TODO(synk): for production hidden sizes (H >= 128) replace this zero-padded
    # block-diagonal with per-head (H, H) matmuls to avoid 2x MXU work / VMEM growth.
    w2 = jax.scipy.linalg.block_diag(*w2_blocks)                  # (2EH, 2EH)
    b2 = jnp.concatenate(b2_blocks, axis=1)                       # (1, 2EH)

    w3 = jnp.zeros((n1, p_out), jnp.float32)                      # (2EH, 128)
    b3 = jnp.zeros((1, p_out), jnp.float32)
    for j, (col, bv) in enumerate(zip(w3_cols, b3_vals)):
        w3 = w3.at[j * H:(j + 1) * H, j].set(col)
        b3 = b3.at[0, j].set(bv)

    # Softplus column mask: std columns are E .. 2E-1.
    mask = jnp.zeros((1, p_out), jnp.float32).at[0, E:2 * E].set(1.0)

    return dict(w1s=w1[:obs_dim], w1a=w1[obs_dim:],               # split => no host concat
                b1=b1, w2=w2, b2=b2, w3=w3, b3=b3, mask=mask)


# ----------------------------------------------------------------------------- params / reference
def init_params(key, obs_dim, act_dim, hidden):
    """Deterministic synthetic parameters (shapes match the nn.Linear layers)."""
    d_in = obs_dim + act_dim
    keys = jax.random.split(key, 12)

    def lin(kw, kb, fan_in, fan_out):
        bound = 1.0 / jnp.sqrt(fan_in)
        w = jax.random.uniform(kw, (fan_in, fan_out), jnp.float32, -bound, bound)
        b = jax.random.uniform(kb, (1, fan_out), jnp.float32, -bound, bound)
        return w, b

    mw1, mb1 = lin(keys[0], keys[1], d_in, hidden)
    mw2, mb2 = lin(keys[2], keys[3], hidden, hidden)
    mw3, mb3 = lin(keys[4], keys[5], hidden, 1)
    sw1, sb1 = lin(keys[6], keys[7], d_in, hidden)
    sw2, sb2 = lin(keys[8], keys[9], hidden, hidden)
    sw3, sb3 = lin(keys[10], keys[11], hidden, 1)

    return dict(mw1=mw1, mb1=mb1, mw2=mw2, mb2=mb2, mw3=mw3, mb3=mb3,
                sw1=sw1, sb1=sb1, sw2=sw2, sb2=sb2, sw3=sw3, sb3=sb3)


def reference_forward(state, action, p):
    """Pure-JAX reference of BaseCritic.forward."""
    x = jnp.concatenate([state, action], axis=1)
    h = jnp.maximum(x @ p["mw1"] + p["mb1"], 0.0)
    h = jnp.maximum(h @ p["mw2"] + p["mb2"], 0.0)
    u = h @ p["mw3"] + p["mb3"]
    g = jnp.maximum(x @ p["sw1"] + p["sb1"], 0.0)
    g = jnp.maximum(g @ p["sw2"] + p["sb2"], 0.0)
    z = g @ p["sw3"] + p["sb3"]
    std = jax.nn.softplus(z) + 1e-6
    return u, std


# ----------------------------------------------------------------------------- main
if __name__ == "__main__":
    key = jax.random.PRNGKey(0)
    batch, obs_dim, act_dim, hidden, ensemble = 8, 16, 4, 32, 3

    keys = jax.random.split(key, 2 + ensemble)
    state = jax.random.normal(keys[0], (batch, obs_dim), jnp.float32)
    action = jax.random.normal(keys[1], (batch, act_dim), jnp.float32)
    per_critic = [init_params(keys[2 + e], obs_dim, act_dim, hidden)
                  for e in range(ensemble)]
    packed = pack_ensemble(per_critic, obs_dim)

    # --- ensemble forward (f32 MXU operands) ---
    u, std = ctd4_ensemble_forward(state, action, packed, num_critics=ensemble)
    jax.block_until_ready((u, std))
    assert u.shape == (ensemble, batch, 1) and std.shape == (ensemble, batch, 1)

    u_ref = jnp.stack([reference_forward(state, action, p)[0] for p in per_critic])
    std_ref = jnp.stack([reference_forward(state, action, p)[1] for p in per_critic])
    assert jnp.allclose(u, u_ref, atol=1e-5), "ensemble mean head mismatch"
    assert jnp.allclose(std, std_ref, atol=1e-5), "ensemble std head mismatch"
    assert bool(jnp.all(std > 0.0)), "std must be positive"

    # --- single-critic API (matches BaseCritic.forward) ---
    u1, std1 = base_critic_forward(state, action, per_critic[0])
    jax.block_until_ready((u1, std1))
    assert u1.shape == (batch, 1) and std1.shape == (batch, 1)
    assert jnp.allclose(u1, u_ref[0], atol=1e-5), "single-critic mean mismatch"
    assert jnp.allclose(std1, std_ref[0], atol=1e-5), "single-critic std mismatch"

    # --- bf16 MXU-operand path (v6e/v7x), f32 accumulation / element-wise ---
    u_bf, std_bf = ctd4_ensemble_forward(state, action, packed, num_critics=ensemble,
                                         matmul_dtype=jnp.bfloat16)
    jax.block_until_ready((u_bf, std_bf))
    assert jnp.allclose(u_bf, u_ref, atol=0.1, rtol=0.1), "bf16 mean head mismatch"
    assert jnp.allclose(std_bf, std_ref, atol=0.1, rtol=0.1), "bf16 std head mismatch"
    assert bool(jnp.all(std_bf > 0.0)), "bf16 std must be positive"

    print("KERNEL_OK")
</pallas_src>

<mosaic_0001>
module attributes {stable_mosaic.version = 11 : i64} {
  func.func @_fused_critic_kernel(%arg0: i32, %arg1: memref<8x16xf32, #tpu.memory_space<vmem>>, %arg2: memref<8x4xf32, #tpu.memory_space<vmem>>, %arg3: memref<16x192xf32, #tpu.memory_space<vmem>>, %arg4: memref<4x192xf32, #tpu.memory_space<vmem>>, %arg5: memref<1x192xf32, #tpu.memory_space<vmem>>, %arg6: memref<192x192xf32, #tpu.memory_space<vmem>>, %arg7: memref<1x192xf32, #tpu.memory_space<vmem>>, %arg8: memref<192x128xf32, #tpu.memory_space<vmem>>, %arg9: memref<1x128xf32, #tpu.memory_space<vmem>>, %arg10: memref<1x128xf32, #tpu.memory_space<vmem>>, %arg11: memref<8x128xf32, #tpu.memory_space<vmem>>) attributes {dimension_semantics = [#tpu.dimension_semantics<parallel>], iteration_bounds = array<i64: 1>, scalar_prefetch = 0 : i64, scratch_operands = 0 : i64, tpu.core_type = #tpu.core_type<tc>, window_params = [{transform_indices = @transform_0, window_bounds = array<i64: 8, 16>}, {transform_indices = @transform_1, window_bounds = array<i64: 8, 4>}, {pipeline_mode = #tpu.pipeline_mode<synchronous>, transform_indices = @transform_2, window_bounds = array<i64: 16, 192>}, {pipeline_mode = #tpu.pipeline_mode<synchronous>, transform_indices = @transform_3, window_bounds = array<i64: 4, 192>}, {pipeline_mode = #tpu.pipeline_mode<synchronous>, transform_indices = @transform_4, window_bounds = array<i64: 1, 192>}, {pipeline_mode = #tpu.pipeline_mode<synchronous>, transform_indices = @transform_5, window_bounds = array<i64: 192, 192>}, {pipeline_mode = #tpu.pipeline_mode<synchronous>, transform_indices = @transform_6, window_bounds = array<i64: 1, 192>}, {pipeline_mode = #tpu.pipeline_mode<synchronous>, transform_indices = @transform_7, window_bounds = array<i64: 192, 128>}, {pipeline_mode = #tpu.pipeline_mode<synchronous>, transform_indices = @transform_8, window_bounds = array<i64: 1, 128>}, {pipeline_mode = #tpu.pipeline_mode<synchronous>, transform_indices = @transform_9, window_bounds = array<i64: 1, 128>}, {transform_indices = @transform_10, window_bounds = array<i64: 8, 128>}]} {
    %c0 = arith.constant 0 : index
    %c0_0 = arith.constant 0 : index
    %0 = vector.load %arg1[%c0, %c0_0] : memref<8x16xf32, #tpu.memory_space<vmem>>, vector<8x16xf32>
    %c0_1 = arith.constant 0 : index
    %c0_2 = arith.constant 0 : index
    %1 = vector.load %arg2[%c0_1, %c0_2] : memref<8x4xf32, #tpu.memory_space<vmem>>, vector<8x4xf32>
    %c0_3 = arith.constant 0 : index
    %c0_4 = arith.constant 0 : index
    %2 = vector.load %arg3[%c0_3, %c0_4] : memref<16x192xf32, #tpu.memory_space<vmem>>, vector<16x192xf32>
    %cst = arith.constant dense<0.000000e+00> : vector<8x192xf32>
    %3 = tpu.matmul %0, %2, %cst {dimension_numbers = #tpu.dot_dimension_numbers<[1], [0], [0], [1], [0, 0, 1, 1], [], []>} : vector<8x16xf32>, vector<16x192xf32>, vector<8x192xf32> -> vector<8x192xf32>
    %c0_5 = arith.constant 0 : index
    %c0_6 = arith.constant 0 : index
    %4 = vector.load %arg4[%c0_5, %c0_6] : memref<4x192xf32, #tpu.memory_space<vmem>>, vector<4x192xf32>
    %cst_7 = arith.constant dense<0.000000e+00> : vector<8x192xf32>
    %5 = tpu.matmul %1, %4, %cst_7 {dimension_numbers = #tpu.dot_dimension_numbers<[1], [0], [0], [1], [0, 0, 1, 1], [], []>} : vector<8x4xf32>, vector<4x192xf32>, vector<8x192xf32> -> vector<8x192xf32>
    %6 = arith.addf %3, %5 : vector<8x192xf32>
    %c0_8 = arith.constant 0 : index
    %c0_9 = arith.constant 0 : index
    %7 = vector.load %arg5[%c0_8, %c0_9] : memref<1x192xf32, #tpu.memory_space<vmem>>, vector<1x192xf32>
    %8 = vector.broadcast %7 : vector<1x192xf32> to vector<8x192xf32>
    %9 = arith.addf %6, %8 : vector<8x192xf32>
    %cst_10 = arith.constant 0.000000e+00 : f32
    %10 = vector.broadcast %cst_10 : f32 to vector<8x192xf32>
    %11 = arith.maximumf %9, %10 : vector<8x192xf32>
    %c0_11 = arith.constant 0 : index
    %c0_12 = arith.constant 0 : index
    %12 = vector.load %arg6[%c0_11, %c0_12] : memref<192x192xf32, #tpu.memory_space<vmem>>, vector<192x192xf32>
    %cst_13 = arith.constant dense<0.000000e+00> : vector<8x192xf32>
    %13 = tpu.matmul %11, %12, %cst_13 {dimension_numbers = #tpu.dot_dimension_numbers<[1], [0], [0], [1], [0, 0, 1, 1], [], []>} : vector<8x192xf32>, vector<192x192xf32>, vector<8x192xf32> -> vector<8x192xf32>
    %c0_14 = arith.constant 0 : index
    %c0_15 = arith.constant 0 : index
    %14 = vector.load %arg7[%c0_14, %c0_15] : memref<1x192xf32, #tpu.memory_space<vmem>>, vector<1x192xf32>
    %15 = vector.broadcast %14 : vector<1x192xf32> to vector<8x192xf32>
    %16 = arith.addf %13, %15 : vector<8x192xf32>
    %cst_16 = arith.constant 0.000000e+00 : f32
    %17 = vector.broadcast %cst_16 : f32 to vector<8x192xf32>
    %18 = arith.maximumf %16, %17 : vector<8x192xf32>
    %c0_17 = arith.constant 0 : index
    %c0_18 = arith.constant 0 : index
    %19 = vector.load %arg8[%c0_17, %c0_18] : memref<192x128xf32, #tpu.memory_space<vmem>>, vector<192x128xf32>
    %cst_19 = arith.constant dense<0.000000e+00> : vector<8x128xf32>
    %20 = tpu.matmul %18, %19, %cst_19 {dimension_numbers = #tpu.dot_dimension_numbers<[1], [0], [0], [1], [0, 0, 1, 1], [], []>} : vector<8x192xf32>, vector<192x128xf32>, vector<8x128xf32> -> vector<8x128xf32>
    %c0_20 = arith.constant 0 : index
    %c0_21 = arith.constant 0 : index
    %21 = vector.load %arg9[%c0_20, %c0_21] : memref<1x128xf32, #tpu.memory_space<vmem>>, vector<1x128xf32>
    %22 = vector.broadcast %21 : vector<1x128xf32> to vector<8x128xf32>
    %23 = arith.addf %20, %22 : vector<8x128xf32>
    %cst_22 = arith.constant 2.000000e+01 : f32
    %24 = vector.broadcast %cst_22 : f32 to vector<8x128xf32>
    %25 = arith.cmpf ogt, %23, %24 : vector<8x128xf32>
    %cst_23 = arith.constant 2.000000e+01 : f32
    %26 = vector.broadcast %cst_23 : f32 to vector<8x128xf32>
    %27 = arith.minimumf %23, %26 : vector<8x128xf32>
    %28 = math.exp %27 : vector<8x128xf32>
    %29 = math.log1p %28 : vector<8x128xf32>
    %30 = arith.select %25, %23, %29 : vector<8x128xi1>, vector<8x128xf32>
    %cst_24 = arith.constant 9.99999997E-7 : f32
    %31 = vector.broadcast %cst_24 : f32 to vector<8x128xf32>
    %32 = arith.addf %30, %31 : vector<8x128xf32>
    %c0_25 = arith.constant 0 : index
    %c0_26 = arith.constant 0 : index
    %33 = vector.load %arg10[%c0_25, %c0_26] : memref<1x128xf32, #tpu.memory_space<vmem>>, vector<1x128xf32>
    %34 = arith.subf %32, %23 : vector<8x128xf32>
    %35 = vector.broadcast %33 : vector<1x128xf32> to vector<8x128xf32>
    %36 = arith.mulf %35, %34 : vector<8x128xf32>
    %37 = arith.addf %23, %36 : vector<8x128xf32>
    %c0_27 = arith.constant 0 : index
    %c0_28 = arith.constant 0 : index
    %38 = vector.load %arg11[%c0_27, %c0_28] : memref<8x128xf32, #tpu.memory_space<vmem>>, vector<8x128xf32>
    tpu.vector_store %arg11[%c0_27, %c0_28], %37 {strides = array<i32>} : memref<8x128xf32, #tpu.memory_space<vmem>>, vector<8x128xf32>,
    return
  }
  func.func @transform_0(%arg0: i32) -> (i32, i32) {
    %c0_i32 = arith.constant 0 : i32
    %c0_i32_0 = arith.constant 0 : i32
    return %arg0, %c0_i32 : i32, i32
  }
  func.func @transform_1(%arg0: i32) -> (i32, i32) {
    %c0_i32 = arith.constant 0 : i32
    %c0_i32_0 = arith.constant 0 : i32
    return %arg0, %c0_i32 : i32, i32
  }
  func.func @transform_2(%arg0: i32) -> (i32, i32) {
    %c0_i32 = arith.constant 0 : i32
    %c0_i32_0 = arith.constant 0 : i32
    %c0_i32_1 = arith.constant 0 : i32
    return %c0_i32, %c0_i32_0 : i32, i32
  }
  func.func @transform_3(%arg0: i32) -> (i32, i32) {
    %c0_i32 = arith.constant 0 : i32
    %c0_i32_0 = arith.constant 0 : i32
    %c0_i32_1 = arith.constant 0 : i32
    return %c0_i32, %c0_i32_0 : i32, i32
  }
  func.func @transform_4(%arg0: i32) -> (i32, i32) {
    %c0_i32 = arith.constant 0 : i32
    %c0_i32_0 = arith.constant 0 : i32
    %c0_i32_1 = arith.constant 0 : i32
    return %c0_i32, %c0_i32_0 : i32, i32
  }
  func.func @transform_5(%arg0: i32) -> (i32, i32) {
    %c0_i32 = arith.constant 0 : i32
    %c0_i32_0 = arith.constant 0 : i32
    %c0_i32_1 = arith.constant 0 : i32
    return %c0_i32, %c0_i32_0 : i32, i32
  }
  func.func @transform_6(%arg0: i32) -> (i32, i32) {
    %c0_i32 = arith.constant 0 : i32
    %c0_i32_0 = arith.constant 0 : i32
    %c0_i32_1 = arith.constant 0 : i32
    return %c0_i32, %c0_i32_0 : i32, i32
  }
  func.func @transform_7(%arg0: i32) -> (i32, i32) {
    %c0_i32 = arith.constant 0 : i32
    %c0_i32_0 = arith.constant 0 : i32
    %c0_i32_1 = arith.constant 0 : i32
    return %c0_i32, %c0_i32_0 : i32, i32
  }
  func.func @transform_8(%arg0: i32) -> (i32, i32) {
    %c0_i32 = arith.constant 0 : i32
    %c0_i32_0 = arith.constant 0 : i32
    %c0_i32_1 = arith.constant 0 : i32
    return %c0_i32, %c0_i32_0 : i32, i32
  }
  func.func @transform_9(%arg0: i32) -> (i32, i32) {
    %c0_i32 = arith.constant 0 : i32
    %c0_i32_0 = arith.constant 0 : i32
    %c0_i32_1 = arith.constant 0 : i32
    return %c0_i32, %c0_i32_0 : i32, i32
  }
  func.func @transform_10(%arg0: i32) -> (i32, i32) {
    %c0_i32 = arith.constant 0 : i32
    %c0_i32_0 = arith.constant 0 : i32
    return %arg0, %c0_i32 : i32, i32
  }
}

</mosaic_0001>

<bundles_post_ra>
// kernel: ctd4_ensemble_forward.1
= control target key start
LH: loop header
LB: loop body
LE: loop exit
PB: predicated region body
PF: predicated region fallthrough
CT: control target
= control target key end

     0   :  { %15 = vsyncpa [#allocation3], 0  ;;  %s907_s0 = inlined_call_operand.hbm [shape: f32[8,16], index: 0, kind: input, shape index: {}]   ;;  %s908_s1 = inlined_call_operand.vmem [shape: f32[8,4], index: 1, kind: input, shape index: {}]   ;;  %s909_s2 = inlined_call_operand.vmem [shape: f32[16,192], index: 2, kind: input, shape index: {}]   ;;  %s910_s3 = inlined_call_operand.hbm [shape: f32[4,192], index: 3, kind: input, shape index: {}]   ;;  %s911_s4 = inlined_call_operand.vmem [shape: f32[1,192], index: 4, kind: input, shape index: {}]   ;;  %s912_s5 = inlined_call_operand.hbm [shape: f32[192,192], index: 5, kind: input, shape index: {}]   ;;  %s913_s6 = inlined_call_operand.vmem [shape: f32[1,192], index: 6, kind: input, shape index: {}]   ;;  %s914_s7 = inlined_call_operand.hbm [shape: f32[192,128], index: 7, kind: input, shape index: {}]   ;;  %s915_s8 = inlined_call_operand.vmem [shape: f32[1,128], index: 8, kind: input, shape index: {}]   ;;  %s916_s9 = inlined_call_operand.vmem [shape: f32[1,128], index: 9, kind: input, shape index: {}]   ;;  %s917_s10 = inlined_call_operand.vmem [shape: f32[8,128], index: 10, kind: output, shape index: {}]  }
   0x1   :  { %16 = vsyncpa [#allocation5], 0 }
   0x2   :  { %17 = vsyncpa [#allocation8], 0  ;;  %s747_s13 = smov [#allocation4]   ;;  %s748_s15 = smov [#allocation2]  }
   0x3   :  { %s38_s14 = sshll.u32 %s747_s13, 4  ;;  %s24_s16 = sshll.u32 %s748_s15, 4  ;;  %s39_s14 = int_to_ptr.vmem [resolvable:$true] %s38_s14  ;;  %s25_s16 = int_to_ptr.vmem [resolvable:$true] %s24_s16 }
   0x4   :  { %s653_s19 = scalar_lea.hbm %s910_s3, 128 }
   0x5   :  { %p654_p0 = scmp.ne.s32.totalorder %s910_s3, %s653_s19  ;;  %p657_p1 = scmp.lt.u32.totalorder %s653_s19, %s910_s3 }
   0x7   :  { %p659_p2 = pnand %p657_p1, %p654_p0 }
   0x9   :  { %662 = shalt.err (!%p659_p2)
}
   0xa   :  { %s663_s24 = scalar_lea.vmem %s39_s14, 128  ;;  %p668_p4 = scmp.lt.s32.totalorder %s39_s14, %s39_s14 }
   0xb   :  { %p664_p3 = scmp.ne.s32.totalorder %s39_s14, %s663_s24  ;;  %p669_p5 = scmp.lt.s32.totalorder %s663_s24, %s663_s24 }
   0xd   :  { %p670_p6 = por %p669_p5, %p668_p4 }
   0xf   :  { %p671_p7 = pnand %p670_p6, %p664_p3 }
  0x11   :  { %674 = shalt.err (!%p671_p7)
}
  0x12   :  { %41 = dma.hbm_to_vmem [thread:$0]  %s910_s3, 128, %s39_s14, [#allocation5]  }
  0x13   :  { %s675_s29 = scalar_lea.hbm %s907_s0, 128 }
  0x14   :  { %p676_p8 = scmp.ne.s32.totalorder %s907_s0, %s675_s29  ;;  %p679_p9 = scmp.lt.u32.totalorder %s675_s29, %s907_s0 }
  0x16   :  { %p681_p10 = pnand %p679_p9, %p676_p8 }
  0x18   :  { %684 = shalt.err (!%p681_p10)
}
  0x19   :  { %s685_s15 = scalar_lea.vmem %s25_s16, 128  ;;  %p690_p12 = scmp.lt.s32.totalorder %s25_s16, %s25_s16 }
  0x1a   :  { %p686_p11 = scmp.ne.s32.totalorder %s25_s16, %s685_s15  ;;  %p691_p13 = scmp.lt.s32.totalorder %s685_s15, %s685_s15 }
  0x1c   :  { %p692_p0 = por %p691_p13, %p690_p12 }
  0x1e   :  { %p693_p1 = pnand %p692_p0, %p686_p11 }
  0x20   :  { %696 = shalt.err (!%p693_p1)
}
  0x21   :  { %27 = dma.hbm_to_vmem [thread:$0]  %s907_s0, 128, %s25_s16, [#allocation3]  }
  0x22   :  { %s749_s17 = smov [#allocation6]   ;;  %s697_s21 = scalar_lea.hbm %s912_s5, 6144 }
  0x23   :  { %s49_s18 = sshll.u32 %s749_s17, 4  ;;  %p698_p2 = scmp.ne.s32.totalorder %s912_s5, %s697_s21  ;;  %s50_s18 = int_to_ptr.vmem [resolvable:$true] %s49_s18 }
  0x24   :  { %p701_p3 = scmp.lt.u32.totalorder %s697_s21, %s912_s5 }
  0x26   :  { %p703_p4 = pnand %p701_p3, %p698_p2 }
  0x28   :  { %706 = shalt.err (!%p703_p4)
}
  0x29   :  { %s707_s26 = scalar_lea.vmem %s50_s18, 6144  ;;  %p712_p6 = scmp.lt.s32.totalorder %s50_s18, %s50_s18 }
  0x2a   :  { %p708_p5 = scmp.ne.s32.totalorder %s50_s18, %s707_s26  ;;  %p713_p7 = scmp.lt.s32.totalorder %s707_s26, %s707_s26 }
  0x2c   :  { %p714_p8 = por %p713_p7, %p712_p6 }
  0x2e   :  { %p715_p9 = pnand %p714_p8, %p708_p5 }
  0x30   :  { %718 = shalt.err (!%p715_p9)
}
  0x31   :  { %s750_s0 = smov 256   ;;  %s751_s16 = smov 16  }
  0x32   :  { %55 = dma.hbm_to_vmem [thread:$0]  %s912_s5, 6144, %s50_s18, [#allocation5], %s750_s0, %s750_s0, %s751_s16  }
  0x33   :  { %s752_s29 = smov [#allocation7]   ;;  %s719_s13 = scalar_lea.hbm %s914_s7, 3072 }
  0x34   :  { %s63_s30 = sshll.u32 %s752_s29, 4  ;;  %p720_p10 = scmp.ne.s32.totalorder %s914_s7, %s719_s13  ;;  %s64_s30 = int_to_ptr.vmem [resolvable:$true] %s63_s30 }
  0x35   :  { %p723_p11 = scmp.lt.u32.totalorder %s719_s13, %s914_s7 }
  0x37   :  { %p725_p12 = pnand %p723_p11, %p720_p10 }
  0x39   :  { %728 = shalt.err (!%p725_p12)
}
  0x3a   :  { %s729_s19 = scalar_lea.vmem %s64_s30, 3072  ;;  %p734_p0 = scmp.lt.s32.totalorder %s64_s30, %s64_s30 }
  0x3b   :  { %p730_p13 = scmp.ne.s32.totalorder %s64_s30, %s729_s19  ;;  %p735_p1 = scmp.lt.s32.totalorder %s729_s19, %s729_s19 }
  0x3d   :  { %p736_p2 = por %p735_p1, %p734_p0 }
  0x3f   :  { %p737_p3 = pnand %p736_p2, %p730_p13 }
  0x41   :  { %740 = shalt.err (!%p737_p3)
}
  0x42   :  { %s753_s5 = smov 128   ;;  %s754_s18 = smov 8  }
  0x43   :  { %69 = dma.hbm_to_vmem [thread:$0]  %s914_s7, 3072, %s64_s30, [#allocation8], %s753_s5, %s753_s5, %s754_s18  }
  0x44   :  { %741 = dma.done.wait [#allocation3], 128  }
  0x45   :  { %742 = vsyncadd [#allocation3], 4294967168 }
  0x46   :  { %743 = dma.done.wait [#allocation5], 6272  }
  0x47   :  { %744 = vsyncadd [#allocation5], 4294961024 }
  0x48   :  { %745 = dma.done.wait [#allocation8], 3072  }
  0x49   :  { %746 = vsyncadd [#allocation8], 4294964224  ;;  %v755_v0 = vmov 0.0   ;;  %v89_v1 = vld [vmem:[%s909_s2 + $0x8] sm:$0xff]  ;;  %v91_v2 = vld [vmem:[%s909_s2 + $0x18] sm:$0xff]  ;;  %vm99_vm0 = vcmask 1043456  }
  0x4a   :  { %168 = vmatprep.mubr.f32.mxu1 %v755_v0  ;;  %243 = vmatprep.mubr.f32.mxu0 %v755_v0  ;;  %v92_v3 = vld [vmem:[#allocation4] sm:$0xff]  ;;  %v548_v4 = vpack.c.bf16 %v91_v2, %v89_v1  ;;  %v88_v6 = vld [vmem:[%s909_s2] sm:$0xff]  ;;  %v90_v7 = vld [vmem:[%s909_s2 + $0x10] sm:$0xff]  ;;  %vm95_vm1 = vcmask 31744   ;;  %vm175_vm2 = vcmask 130048   ;;  %vm326_vm3 = vcmask 523264  }
  0x4b   :  { %v94_v5 = vcombine.high %v92_v3, %v92_v3  ;;  %v87_v8 = vld [vmem:[%s908_s1] sm:$0xff]  ;;  %v550_v9 = vpack.c.bf16 %v90_v7, %v88_v6  ;;  %v267_v11 = vld [vmem:[#allocation6 + $0x8] sm:$0xff]  ;;  %v269_v12 = vld [vmem:[#allocation6 + $0x18] sm:$0xff] }
  0x4c   :  { %v86_v10 = vld [vmem:[#allocation2] sm:$0xff]  ;;  %549 = vmatprep.subr.bf16.mxu0 %v548_v4  ;;  %v552_v13 = vpack.c.bf16 %v269_v12, %v267_v11  ;;  %v266_v14 = vld [vmem:[#allocation6] sm:$0xff]  ;;  %v271_v16 = vld [vmem:[#allocation6 + $0x28] sm:$0xff] }
  0x4d   :  { %540 = vmatprep.subr.msk.mxu1 %vm99_vm0, %v94_v5  ;;  %v268_v15 = vld [vmem:[#allocation6 + $0x10] sm:$0xff]  ;;  %551 = vmatpush1.bf16.msra.mxu0 %v550_v9  ;;  %v273_v18 = vld [vmem:[#allocation6 + $0x38] sm:$0xff]  ;;  %v270_v19 = vld [vmem:[#allocation6 + $0x20] sm:$0xff] }
  0x4e   :  { %541 = vmatpush1.msk.msra.mxu1 %vm99_vm0, %v92_v3  ;;  %v554_v17 = vpack.c.bf16 %v268_v15, %v266_v14  ;;  %v272_v20 = vld [vmem:[#allocation6 + $0x30] sm:$0xff]  ;;  %v556_v21 = vpack.c.bf16 %v273_v18, %v271_v16  ;;  %v275_v22 = vld [vmem:[#allocation6 + $0x48] sm:$0xff]  ;;  %v277_v23 = vld [vmem:[#allocation6 + $0x58] sm:$0xff] }
  0x4f   :  { %542 = vmatmul.mubr.msk.f32.vlgmr.msra.gmra.mrb[0].mxu1 %vm95_vm1, %v87_v8  ;;  %553 = vmatprep.subr.bf16.mxu1 %v552_v13  ;;  %v558_v24 = vpack.c.bf16 %v272_v20, %v270_v19  ;;  %v560_v25 = vpack.c.bf16 %v277_v23, %v275_v22  ;;  %v274_v26 = vld [vmem:[#allocation6 + $0x40] sm:$0xff]  ;;  %v276_v27 = vld [vmem:[#allocation6 + $0x50] sm:$0xff]  ;;  %v279_v28 = vld [vmem:[#allocation6 + $0x68] sm:$0xff]  ;;  %v756_v22 = vmov 0.0|0.0  }
  0x50   :  { %555 = vmatpush1.bf16.msra.mxu1 %v554_v17  ;;  %543 = vmatmul.mubr.msk.f32.vlgmr.msra.gmra.mrb[0].mxu0 %vm175_vm2, %v86_v10  ;;  %v281_v29 = vld [vmem:[#allocation6 + $0x78] sm:$0xff]  ;;  %v562_v30 = vpack.c.bf16 %v276_v27, %v274_v26  ;;  %v278_v32 = vld [vmem:[#allocation6 + $0x60] sm:$0xff]  ;;  %v280_v33 = vld [vmem:[#allocation6 + $0x70] sm:$0xff] }
  0x51   :  { %557 = vmatprep.subr.bf16.mxu1 %v556_v21  ;;  %v564_v31 = vpack.c.bf16 %v281_v29, %v279_v28  ;;  %v283_v34 = vld [vmem:[#allocation6 + $0x88] sm:$0xff]  ;;  %v285_v35 = vld [vmem:[#allocation6 + $0x98] sm:$0xff]  ;;  %v566_v36 = vpack.c.bf16 %v280_v33, %v278_v32  ;;  %v282_v38 = vld [vmem:[#allocation6 + $0x80] sm:$0xff]  ;;  %600 = vmatprep.subr.bf16.mxu0 %v756_v22 }
  0x52   :  { %v568_v37 = vpack.c.bf16 %v285_v35, %v283_v34  ;;  %v284_v39 = vld [vmem:[#allocation6 + $0x90] sm:$0xff]  ;;  %v287_v40 = vld [vmem:[#allocation6 + $0xa8] sm:$0xff]  ;;  %v289_v41 = vld [vmem:[#allocation6 + $0xb8] sm:$0xff] }
  0x53   :  { %v570_v42 = vpack.c.bf16 %v284_v39, %v282_v38  ;;  %v572_v43 = vpack.c.bf16 %v289_v41, %v287_v40  ;;  %v286_v44 = vld [vmem:[#allocation6 + $0xa0] sm:$0xff]  ;;  %v288_v45 = vld [vmem:[#allocation6 + $0xb0] sm:$0xff]  ;;  %v291_v46 = vld [vmem:[#allocation6 + $0xc8] sm:$0xff] }
  0x54   :  { %559 = vmatpush1.bf16.msra.mxu1 %v558_v24  ;;  %v293_v47 = vld [vmem:[#allocation6 + $0xd8] sm:$0xff]  ;;  %v574_v48 = vpack.c.bf16 %v288_v45, %v286_v44  ;;  %v290_v50 = vld [vmem:[#allocation6 + $0xc0] sm:$0xff]  ;;  %v292_v51 = vld [vmem:[#allocation6 + $0xd0] sm:$0xff] }
  0x55   :  { %561 = vmatprep.subr.bf16.mxu1 %v560_v25  ;;  %v576_v49 = vpack.c.bf16 %v293_v47, %v291_v46  ;;  %v295_v52 = vld [vmem:[#allocation6 + $0xe8] sm:$0xff]  ;;  %v297_v53 = vld [vmem:[#allocation6 + $0xf8] sm:$0xff]  ;;  %v578_v54 = vpack.c.bf16 %v292_v51, %v290_v50  ;;  %v294_v56 = vld [vmem:[#allocation6 + $0xe0] sm:$0xff]  ;;  %v252_v50 = vlaneseq }
  0x56   :  { %v580_v55 = vpack.c.bf16 %v297_v53, %v295_v52  ;;  %v296_v57 = vld [vmem:[#allocation6 + $0xf0] sm:$0xff]  ;;  %v299_v58 = vld [vmem:[#allocation6 + $0x108] sm:$0xff]  ;;  %v301_v59 = vld [vmem:[#allocation6 + $0x118] sm:$0xff] }
  0x57   :  { %v582_v60 = vpack.c.bf16 %v296_v57, %v294_v56  ;;  %v584_v61 = vpack.c.bf16 %v301_v59, %v299_v58  ;;  %v298_v62 = vld [vmem:[#allocation6 + $0x100] sm:$0xff]  ;;  %v300_v63 = vld [vmem:[#allocation6 + $0x110] sm:$0xff]  ;;  %v303_v0 = vld [vmem:[#allocation6 + $0x128] sm:$0xff]  ;;  %v253_v51 = vshrl.u32 %v252_v50, 7 }
  0x58   :  { %563 = vmatpush1.bf16.msra.mxu1 %v562_v30  ;;  %v305_v1 = vld [vmem:[#allocation6 + $0x138] sm:$0xff]  ;;  %v586_v2 = vpack.c.bf16 %v300_v63, %v298_v62  ;;  %v302_v4 = vld [vmem:[#allocation6 + $0x120] sm:$0xff]  ;;  %v304_v5 = vld [vmem:[#allocation6 + $0x130] sm:$0xff] }
  0x59   :  { %565 = vmatprep.subr.bf16.mxu1 %v564_v31  ;;  %v588_v3 = vpack.c.bf16 %v305_v1, %v303_v0  ;;  %v590_v6 = vpack.c.bf16 %v304_v5, %v302_v4  ;;  %v307_v7 = vld [vmem:[#allocation6 + $0x148] sm:$0xff]  ;;  %v309_v8 = vld [vmem:[#allocation6 + $0x158] sm:$0xff]  ;;  %v306_v10 = vld [vmem:[#allocation6 + $0x140] sm:$0xff]  ;;  %v254_v52 = vsub.s32 0, %v253_v51 }
  0x5a   :  { %v592_v9 = vpack.c.bf16 %v309_v8, %v307_v7  ;;  %v308_v11 = vld [vmem:[#allocation6 + $0x150] sm:$0xff]  ;;  %v311_v13 = vld [vmem:[#allocation6 + $0x168] sm:$0xff]  ;;  %v313_v14 = vld [vmem:[#allocation6 + $0x178] sm:$0xff] }
  0x5b   :  { %v594_v12 = vpack.c.bf16 %v308_v11, %v306_v10  ;;  %v596_v15 = vpack.c.bf16 %v313_v14, %v311_v13  ;;  %v310_v16 = vld [vmem:[#allocation6 + $0x160] sm:$0xff]  ;;  %v312_v17 = vld [vmem:[#allocation6 + $0x170] sm:$0xff]  ;;  %v404_v20 = vld [vmem:[#allocation7 + $0x8] sm:$0xff] }
  0x5c   :  { %567 = vmatpush1.bf16.msra.mxu1 %v566_v36  ;;  %v598_v18 = vpack.c.bf16 %v312_v17, %v310_v16  ;;  %v403_v19 = vld [vmem:[#allocation7] sm:$0xff]  ;;  %v405_v21 = vld [vmem:[#allocation7 + $0x10] sm:$0xff]  ;;  %v406_v24 = vld [vmem:[#allocation7 + $0x18] sm:$0xff] }
  0x5d   :  { %569 = vmatprep.subr.bf16.mxu1 %v568_v37  ;;  %v601_v23 = vpack.c.bf16 %v404_v20, %v403_v19  ;;  %v604_v25 = vpack.c.bf16 %v406_v24, %v405_v21  ;;  %v407_v26 = vld [vmem:[#allocation7 + $0x20] sm:$0xff]  ;;  %v408_v27 = vld [vmem:[#allocation7 + $0x28] sm:$0xff]  ;;  %v409_v29 = vld [vmem:[#allocation7 + $0x30] sm:$0xff] }
  0x5e   :  { %v607_v28 = vpack.c.bf16 %v408_v27, %v407_v26  ;;  %v410_v30 = vld [vmem:[#allocation7 + $0x38] sm:$0xff]  ;;  %v411_v32 = vld [vmem:[#allocation7 + $0x40] sm:$0xff]  ;;  %v412_v33 = vld [vmem:[#allocation7 + $0x48] sm:$0xff] }
  0x5f   :  { %602 = vmatpush1.bf16.msra.mxu0 %v601_v23  ;;  %v610_v31 = vpack.c.bf16 %v410_v30, %v409_v29  ;;  %v613_v34 = vpack.c.bf16 %v412_v33, %v411_v32  ;;  %v413_v35 = vld [vmem:[#allocation7 + $0x50] sm:$0xff]  ;;  %v414_v36 = vld [vmem:[#allocation7 + $0x58] sm:$0xff]  ;;  %v415_v38 = vld [vmem:[#allocation7 + $0x60] sm:$0xff] }
  0x60   :  { %571 = vmatpush1.bf16.msra.mxu1 %v570_v42  ;;  %603 = vmatprep.subr.bf16.mxu0 %v756_v22  ;;  %v616_v37 = vpack.c.bf16 %v414_v36, %v413_v35  ;;  %v416_v39 = vld [vmem:[#allocation7 + $0x68] sm:$0xff]  ;;  %v417_v41 = vld [vmem:[#allocation7 + $0x70] sm:$0xff]  ;;  %v418_v42 = vld [vmem:[#allocation7 + $0x78] sm:$0xff] }
  0x61   :  { %573 = vmatprep.subr.bf16.mxu1 %v572_v43  ;;  %v619_v40 = vpack.c.bf16 %v416_v39, %v415_v38  ;;  %v622_v43 = vpack.c.bf16 %v418_v42, %v417_v41  ;;  %v419_v44 = vld [vmem:[#allocation7 + $0x80] sm:$0xff]  ;;  %v420_v45 = vld [vmem:[#allocation7 + $0x88] sm:$0xff]  ;;  %v421_v47 = vld [vmem:[#allocation7 + $0x90] sm:$0xff] }
  0x62   :  { %v625_v46 = vpack.c.bf16 %v420_v45, %v419_v44  ;;  %v250_v53 = vld [vmem:[%s911_s4] sm:$0x3]  ;;  %v424_v4 = vld [vmem:[#allocation7 + $0xa8] sm:$0xff]  ;;  %v426_v7 = vld [vmem:[#allocation7 + $0xb8] sm:$0xff] }
  0x63   :  { %605 = vmatpush1.bf16.msra.mxu0 %v604_v25  ;;  %v255_v57 = vrot.slane %v250_v53, %v254_v52  ;;  %v547_v35 = vld [vmem:[%s916_s9] ss:$0 sm:$0xff] }
  0x64   :  { %575 = vmatpush1.bf16.msra.mxu1 %v574_v48  ;;  %606 = vmatprep.subr.bf16.mxu0 %v756_v22  ;;  %v422_v48 = vld [vmem:[#allocation7 + $0x98] sm:$0xff] }
  0x65   :  { %577 = vmatprep.subr.bf16.mxu1 %v576_v49  ;;  %v628_v49 = vpack.c.bf16 %v422_v48, %v421_v47 }
  0x67   :  { %608 = vmatpush1.bf16.msra.mxu0 %v607_v28 }
  0x68   :  { %579 = vmatpush1.bf16.msra.mxu1 %v578_v54  ;;  %609 = vmatprep.subr.bf16.mxu0 %v756_v22  ;;  %v258_v54 = vsub.s32 1, %v253_v51 }
  0x69   :  { %581 = vmatprep.subr.bf16.mxu1 %v580_v55 }
  0x6a   :  { %v259_v59 = vrot.slane %v250_v53, %v258_v54 }
  0x6b   :  { %611 = vmatpush1.bf16.msra.mxu0 %v610_v31 }
  0x6c   :  { %583 = vmatpush1.bf16.msra.mxu1 %v582_v60  ;;  %612 = vmatprep.subr.bf16.mxu0 %v756_v22 }
  0x6d   :  { %585 = vmatprep.subr.bf16.mxu1 %v584_v61 }
  0x6f   :  { %614 = vmatpush1.bf16.msra.mxu0 %v613_v34 }
  0x70   :  { %587 = vmatpush1.bf16.msra.mxu1 %v586_v2  ;;  %615 = vmatprep.subr.bf16.mxu0 %v756_v22 }
  0x71   :  { %589 = vmatprep.subr.bf16.mxu1 %v588_v3  ;;  %v423_v3 = vld [vmem:[#allocation7 + $0xa0] sm:$0xff] }
  0x72   :  { %v631_v5 = vpack.c.bf16 %v424_v4, %v423_v3 }
  0x73   :  { %617 = vmatpush1.bf16.msra.mxu0 %v616_v37 }
  0x74   :  { %591 = vmatpush1.bf16.msra.mxu1 %v590_v6  ;;  %618 = vmatprep.subr.bf16.mxu0 %v756_v22  ;;  %v425_v6 = vld [vmem:[#allocation7 + $0xb0] sm:$0xff] }
  0x75   :  { %593 = vmatprep.subr.bf16.mxu1 %v592_v9  ;;  %v634_v8 = vpack.c.bf16 %v426_v7, %v425_v6  ;;  %v314_v9 = vld [vmem:[%s913_s6] sm:$0x3] }
  0x76   :  { %v319_v10 = vrot.slane %v314_v9, %v254_v52  ;;  %v323_v11 = vrot.slane %v314_v9, %v258_v54 }
  0x77   :  { %620 = vmatpush1.bf16.msra.mxu0 %v619_v40 }
  0x78   :  { %595 = vmatpush1.bf16.msra.mxu1 %v594_v12  ;;  %621 = vmatprep.subr.bf16.mxu0 %v756_v22 }
  0x79   :  { %597 = vmatprep.subr.bf16.mxu1 %v596_v15 }
  0x7b   :  { %623 = vmatpush1.bf16.msra.mxu0 %v622_v43 }
  0x7c   :  { %599 = vmatpush1.bf16.msra.mxu1 %v598_v18  ;;  %624 = vmatprep.subr.bf16.mxu0 %v756_v22  ;;  %v545_v18 = vld [vmem:[%s915_s8] ss:$0 sm:$0xff] }
  0x7f   :  { %626 = vmatpush1.bf16.msra.mxu0 %v625_v46 }
  0x80   :  { %627 = vmatprep.subr.bf16.mxu0 %v756_v22 }
  0x83   :  { %629 = vmatpush1.bf16.msra.mxu0 %v628_v49 }
  0x84   :  { %630 = vmatprep.subr.bf16.mxu0 %v756_v22 }
  0x87   :  { %632 = vmatpush1.bf16.msra.mxu0 %v631_v5 }
  0x88   :  { %633 = vmatprep.subr.bf16.mxu0 %v756_v22 }
  0x8b   :  { %635 = vmatpush1.bf16.msra.mxu0 %v634_v8 }
 0x122   :  { %v170_v55 = vpop.f32.mrb[0].mxu1 }
 0x123   :  { %v172_v56 = vpop.f32.mrb[1].mxu1  ;;  %v245_v58 = vpop.f32.mrb[0].mxu0 }
 0x124   :  { %v246_v60 = vadd.f32 %v245_v58, %v170_v55  ;;  %v247_v61 = vpop.f32.mrb[1].mxu0 }
 0x125   :  { %v248_v62 = vadd.f32 %v247_v61, %v172_v56 }
 0x126   :  { %v262_v63 = vadd.f32 %v255_v57, %v246_v60 }
 0x127   :  { %v263_v0 = vadd.f32 %v259_v59, %v248_v62 }
 0x128   :  { %v264_v2 = vmax.f32 %v262_v63, 0.0 }
 0x129   :  { %v265_v1 = vmax.f32 %v263_v0, 0.0 }
 0x12b   :  { %544 = vmatprep.mubr.msk.f32.mxu1 %vm326_vm3, %v265_v1 }
 0x12c   :  { %395 = vmatmul.mubr.f32.vlgmr.msra.gmra.mrb[2].mxu1 %v264_v2 }
 0x1ff   :  { %v396_v12 = vpop.f32.mrb[2].mxu1 }
 0x200   :  { %v397_v13 = vadd.f32 %v396_v12, %v319_v10  ;;  %v398_v14 = vpop.f32.mrb[3].mxu1 }
 0x201   :  { %v399_v15 = vadd.f32 %v398_v14, %v323_v11 }
 0x202   :  { %v401_v17 = vmax.f32 %v397_v13, 0.0 }
 0x203   :  { %v402_v16 = vmax.f32 %v399_v15, 0.0 }
 0x205   :  { %546 = vmatprep.mubr.msk.f32.mxu0 %vm326_vm3, %v402_v16 }
 0x206   :  { %502 = vmatmul.mubr.f32.vlgmr.msra.gmra.mrb[2].mxu0 %v401_v17 }
 0x2d9   :  { %v503_v19 = vpop.f32.mrb[2].mxu0 }
 0x2da   :  { %v504_v20 = vadd.f32 %v545_v18, %v503_v19  ;;  %v505_v21 = vpop.f32.mrb[3].mxu0 }
 0x2dc   :  { %v508_v22 = vmin.f32 %v504_v20, 20.0  ;;  %vm507_vm5 = vcmp.gt.f32.partialorder %v504_v20, 20.0 }
 0x2de   :  { %v509_v23 = vmul.f32 1.442695, %v508_v22 }
 0x2e0   :  { %649 = vpow2.f32 %v509_v23 }
 0x2ea   :  { %v650_v24 = vpop.eup %649 }
 0x2eb   :  { %v511_v25 = vadd.f32 1.0, %v650_v24  ;;  %v514_v26 = vmul.f32 -0.5, %v650_v24  ;;  %v517_v28 = vand.u32 2147483647, %v650_v24 }
 0x2ed   :  { %651 = vlog2.f32 %v511_v25  ;;  %v515_v27 = vadd.f32 1.0, %v514_v26  ;;  %vm518_vm4 = vcmp.lt.f32.partialorder %v517_v28, 0.0004427343 }
 0x2ef   :  { %v516_v31 = vmul.f32 %v650_v24, %v515_v27 }
 0x2f7   :  { %v652_v29 = vpop.eup %651 }
 0x2f8   :  { %v513_v30 = vmul.f32 0.6931472, %v652_v29 }
 0x2fa   :  { %v519_v32 = vsel %vm518_vm4, %v516_v31, %v513_v30 }
 0x2fb   :  { %v520_v33 = vsel %vm507_vm5, %v504_v20, %v519_v32 }
 0x2fc   :  { %v521_v34 = vadd.f32 1e-06, %v520_v33 }
 0x2fe   :  { %v523_v36 = vsub.f32 %v521_v34, %v504_v20 }
 0x300   :  { %v530_v37 = vmul.f32 %v547_v35, %v523_v36 }
 0x302   :  { %v531_v38 = vadd.f32 %v530_v37, %v504_v20 }
 0x304   :  { %532 = vst [vmem:[%s917_s10] sm:$0xff] %v531_v38 }
 0x305   :  { %537 = vsyncpa [#allocation3], 1 }
 0x306   :  { %538 = vsyncpa [#allocation5], 1 }
 0x307   :  { %539 = vsyncpa [#allocation8], 1 }

</bundles_post_ra>
